<compile_context>
chip_gen: v5e
topology: v5e:2x2
jax: 0.10.0
libtpu: 0.0.40
codegen_flags: <defaults>
</compile_context>

<pallas_src>
import functools

import jax
import jax.numpy as jnp
from jax import lax
from jax.experimental import pallas as pl
from jax.experimental.pallas import tpu as pltpu


_LANE = 128
_SUBLANE = 8
_H_CHUNK = 2048                    # max hidden columns per in-kernel chunk
_VMEM_TILE_BUDGET = 24 * 2**20     # conservative working-set budget (fits v7x 64 MiB VMEM)


def _round_up(a, b):
    return ((a + b - 1) // b) * b


def _gelu_tanh(h):
    # tanh-form GELU: tanh runs on the EUP slot, keeping VALU pressure low on the
    # (TM, Hf) tensor. Max deviation from the exact erf form is ~3e-3, well inside
    # bf16-matmul noise / test tolerance.
    c = 0.7978845608028654  # sqrt(2/pi)
    return 0.5 * h * (1.0 + jnp.tanh(c * (h + 0.044715 * h * h * h)))


def _ffn_kernel(x_ref, w1T_ref, b1_ref, w2T_ref, b2_ref, gamma_ref, beta_ref,
                out_ref, *, ln_eps, d_real):
    xv = x_ref[...]                              # (TM, Dp), native dtype
    x32 = xv.astype(jnp.float32)                 # residual path in f32
    xb = xv.astype(jnp.bfloat16)                 # MXU operand

    tm, dp = out_ref.shape
    hp = w1T_ref.shape[1]

    # Linear1 -> GELU -> Linear2, chunked along the hidden dim so the f32
    # intermediate never exceeds (TM, _H_CHUNK).
    acc = jnp.zeros((tm, dp), jnp.float32)
    for c0 in range(0, hp, _H_CHUNK):
        cs = min(_H_CHUNK, hp - c0)
        h = jnp.dot(xb, w1T_ref[:, pl.ds(c0, cs)],
                    preferred_element_type=jnp.float32) + b1_ref[:, pl.ds(c0, cs)]
        h = _gelu_tanh(h)
        acc = acc + jnp.dot(h.astype(jnp.bfloat16), w2T_ref[pl.ds(c0, cs), :],
                            preferred_element_type=jnp.float32)

    # TODO(synk): nn.Dropout layers are identity here (eval-mode semantics).

    # Residual + LayerNorm over the real feature width d_real. Padded lanes of
    # x / W2^T / b2 are exact zeros, so plain lane-sums give the correct mean.
    z = x32 + acc + b2_ref[...]
    inv_d = 1.0 / d_real
    mean = jnp.sum(z, axis=-1, keepdims=True) * inv_d
    zc = z - mean
    if d_real != dp:
        lane = lax.broadcasted_iota(jnp.int32, (tm, dp), 1)
        zc = jnp.where(lane < d_real, zc, 0.0)
    var = jnp.sum(zc * zc, axis=-1, keepdims=True) * inv_d
    zn = zc * lax.rsqrt(var + ln_eps)
    out_ref[...] = (zn * gamma_ref[...] + beta_ref[...]).astype(out_ref.dtype)


def prepare_ffn_params(params):
    """One-time prep: transpose weights, cast MXU operands to bf16, and zero-pad
    feature/hidden dims up to multiples of 128 (lane-dense I/O + MXU fill)."""
    f32, bf16 = jnp.float32, jnp.bfloat16
    w1, b1 = params['w1'], params['b1']          # (H, D), (H,)
    w2, b2 = params['w2'], params['b2']          # (D, H), (D,)
    Hf, D = w1.shape
    Dp, Hp = _round_up(D, _LANE), _round_up(Hf, _LANE)

    def pad2(a, r, c):
        return jnp.pad(a, ((0, r - a.shape[0]), (0, c - a.shape[1])))

    return {
        'd_real': D,
        'w1T': pad2(w1.T.astype(f32), Dp, Hp).astype(bf16),     # (Dp, Hp)
        'b1': pad2(b1.reshape(1, Hf), 1, Hp).astype(f32),
        'w2T': pad2(w2.T.astype(f32), Hp, Dp).astype(bf16),     # (Hp, Dp)
        'b2': pad2(b2.reshape(1, D), 1, Dp).astype(f32),
        'gamma': pad2(params['ln_weight'].reshape(1, D), 1, Dp).astype(f32),
        'beta': pad2(params['ln_bias'].reshape(1, D), 1, Dp).astype(f32),
    }


def _choose_block_rows(Dp, Hp, in_bytes, out_bytes, max_rows):
    h_chunk = min(Hp, _H_CHUNK)
    weight_bytes = 2 * Dp * Hp * 2 + 4 * (Dp + Hp) * 4   # single-buffered bf16 W1^T/W2^T + biases
    per_row = (2 * Dp * in_bytes + 2 * Dp * out_bytes    # double-buffered x / out tiles
               + 3 * Dp * 4                              # f32 residual / acc / z
               + h_chunk * 6)                            # f32 h chunk + bf16 copy
    tm = (_VMEM_TILE_BUDGET - weight_bytes) // max(per_row, 1)
    return int(max(_SUBLANE, min(max_rows, (tm // _SUBLANE) * _SUBLANE)))


def feed_forward(x, prepared, ln_eps=1e-5, block_rows=512):
    """Pallas equivalent of FeedForward.forward (eval mode)."""
    D = prepared['d_real']
    Dp, Hp = prepared['w1T'].shape
    assert x.shape[-1] == D

    x2 = x.reshape(-1, D)                    # stream x in its native dtype
    M = x2.shape[0]
    in_bytes = x2.dtype.itemsize

    TM = min(block_rows, _choose_block_rows(Dp, Hp, in_bytes, in_bytes, block_rows))
    if M <= TM:
        if M >= 256:
            # >=2 grid steps so the 'parallel' row axis can shard across v7x's 2 TCs.
            TM = min(TM, _round_up(pl.cdiv(M, 2), _SUBLANE))
        else:
            TM = _round_up(M, _SUBLANE)      # tiny / latency-bound: single grid step
    Mp = _round_up(M, TM)

    if Mp != M or Dp != D:
        x2 = jnp.pad(x2, ((0, Mp - M), (0, Dp - D)))

    grid = (Mp // TM,)

    fixed_kw = {'pipeline_mode': pl.Buffered(1)} if hasattr(pl, 'Buffered') else {}

    def fixed(shape):
        # Constant-index blocks (weights/biases): single-buffered, resident in VMEM.
        return pl.BlockSpec(shape, lambda i: (0,) * len(shape), **fixed_kw)

    weight_bytes = 2 * Dp * Hp * 2
    cost = pl.CostEstimate(
        flops=4 * Mp * Dp * Hp,              # two matmuls
        transcendentals=Mp * Hp,             # one tanh per hidden element
        bytes_accessed=Mp * Dp * 2 * in_bytes + weight_bytes,
    )
    vmem_est = (weight_bytes
                + 4 * TM * Dp * in_bytes
                + 3 * TM * Dp * 4
                + min(Hp, _H_CHUNK) * TM * 6)
    vmem_limit = int(min(64 * 2**20, max(16 * 2**20, 2 * vmem_est)))

    out = pl.pallas_call(
        functools.partial(_ffn_kernel, ln_eps=ln_eps, d_real=D),
        out_shape=jax.ShapeDtypeStruct((Mp, Dp), x2.dtype),
        grid=grid,
        in_specs=[
            pl.BlockSpec((TM, Dp), lambda i: (i, 0)),   # x rows (lane-dense)
            fixed((Dp, Hp)),                            # W1^T (bf16)
            fixed((1, Hp)),                             # b1   (f32)
            fixed((Hp, Dp)),                            # W2^T (bf16)
            fixed((1, Dp)),                             # b2
            fixed((1, Dp)),                             # gamma
            fixed((1, Dp)),                             # beta
        ],
        out_specs=pl.BlockSpec((TM, Dp), lambda i: (i, 0)),
        compiler_params=pltpu.CompilerParams(
            dimension_semantics=("parallel",),
            vmem_limit_bytes=vmem_limit),
        cost_estimate=cost,
    )(x2, prepared['w1T'], prepared['b1'], prepared['w2T'], prepared['b2'],
      prepared['gamma'], prepared['beta'])

    return out[:M, :D].reshape(x.shape)


def _ref_forward(x, params, ln_eps=1e-5):
    """Pure-JAX f32 reference mirroring the PyTorch module (eval mode)."""
    h = x @ params['w1'].T + params['b1']
    h = 0.5 * h * (1.0 + lax.erf(h / jnp.sqrt(2.0)))          # exact GELU
    y = h @ params['w2'].T + params['b2']
    z = x + y
    mean = z.mean(-1, keepdims=True)
    var = ((z - mean) ** 2).mean(-1, keepdims=True)
    zn = (z - mean) / jnp.sqrt(var + ln_eps)
    return zn * params['ln_weight'] + params['ln_bias']


if __name__ == "__main__":
    B, L, D, FF = 2, 8, 32, 4          # dim=32, ff_mult=4 -> hidden=128
    Hf = D * FF

    key = jax.random.PRNGKey(0)
    keys = jax.random.split(key, 5)
    params = {
        'w1': 0.05 * jax.random.normal(keys[0], (Hf, D), jnp.float32),
        'b1': 0.05 * jax.random.normal(keys[1], (Hf,), jnp.float32),
        'w2': 0.05 * jax.random.normal(keys[2], (D, Hf), jnp.float32),
        'b2': 0.05 * jax.random.normal(keys[3], (D,), jnp.float32),
        'ln_weight': jnp.ones((D,), jnp.float32),     # nn.LayerNorm defaults
        'ln_bias': jnp.zeros((D,), jnp.float32),
    }

    x = jax.random.normal(keys[4], (B, L, D), jnp.float32)

    prepared = prepare_ffn_params(params)
    out = jax.block_until_ready(feed_forward(x, prepared))

    ref = _ref_forward(x, params)
    assert out.shape == ref.shape
    assert bool(jnp.all(jnp.isfinite(out)))
    # bf16 MXU operands + tanh-form GELU -> slightly loosened tolerance vs f32/erf ref
    max_err = float(jnp.max(jnp.abs(out - ref)))
    assert jnp.allclose(out, ref, atol=2e-2, rtol=2e-2), max_err

    print("KERNEL_OK")
</pallas_src>

<mosaic_0001>
module attributes {stable_mosaic.version = 11 : i64} {
  func.func @_ffn_kernel(%arg0: i32, %arg1: memref<16x128xf32, #tpu.memory_space<vmem>>, %arg2: memref<128x128xbf16, #tpu.memory_space<vmem>>, %arg3: memref<1x128xf32, #tpu.memory_space<vmem>>, %arg4: memref<128x128xbf16, #tpu.memory_space<vmem>>, %arg5: memref<1x128xf32, #tpu.memory_space<vmem>>, %arg6: memref<1x128xf32, #tpu.memory_space<vmem>>, %arg7: memref<1x128xf32, #tpu.memory_space<vmem>>, %arg8: memref<16x128xf32, #tpu.memory_space<vmem>>) attributes {dimension_semantics = [#tpu.dimension_semantics<parallel>], iteration_bounds = array<i64: 1>, scalar_prefetch = 0 : i64, scratch_operands = 0 : i64, tpu.core_type = #tpu.core_type<tc>, window_params = [{transform_indices = @transform_0, window_bounds = array<i64: 16, 128>}, {pipeline_mode = #tpu.pipeline_mode<synchronous>, transform_indices = @transform_1, window_bounds = array<i64: 128, 128>}, {pipeline_mode = #tpu.pipeline_mode<synchronous>, transform_indices = @transform_2, window_bounds = array<i64: 1, 128>}, {pipeline_mode = #tpu.pipeline_mode<synchronous>, transform_indices = @transform_3, window_bounds = array<i64: 128, 128>}, {pipeline_mode = #tpu.pipeline_mode<synchronous>, transform_indices = @transform_4, window_bounds = array<i64: 1, 128>}, {pipeline_mode = #tpu.pipeline_mode<synchronous>, transform_indices = @transform_5, window_bounds = array<i64: 1, 128>}, {pipeline_mode = #tpu.pipeline_mode<synchronous>, transform_indices = @transform_6, window_bounds = array<i64: 1, 128>}, {transform_indices = @transform_7, window_bounds = array<i64: 16, 128>}]} {
    %c0 = arith.constant 0 : index
    %c0_0 = arith.constant 0 : index
    %0 = vector.load %arg1[%c0, %c0_0] : memref<16x128xf32, #tpu.memory_space<vmem>>, vector<16x128xf32>
    %1 = arith.truncf %0 : vector<16x128xf32> to vector<16x128xbf16>
    %cst = arith.constant 0.000000e+00 : f32
    %2 = vector.broadcast %cst : f32 to vector<16x128xf32>
    %c0_1 = arith.constant 0 : index
    %c0_2 = arith.constant 0 : index
    %3 = vector.load %arg2[%c0_1, %c0_2] : memref<128x128xbf16, #tpu.memory_space<vmem>>, vector<128x128xbf16>
    %cst_3 = arith.constant dense<0.000000e+00> : vector<16x128xf32>
    %4 = tpu.matmul %1, %3, %cst_3 {dimension_numbers = #tpu.dot_dimension_numbers<[1], [0], [0], [1], [0, 0, 1, 1], [], []>} : vector<16x128xbf16>, vector<128x128xbf16>, vector<16x128xf32> -> vector<16x128xf32>
    %c0_4 = arith.constant 0 : index
    %c0_5 = arith.constant 0 : index
    %5 = vector.load %arg3[%c0_4, %c0_5] : memref<1x128xf32, #tpu.memory_space<vmem>>, vector<1x128xf32>
    %6 = vector.broadcast %5 : vector<1x128xf32> to vector<16x128xf32>
    %7 = arith.addf %4, %6 : vector<16x128xf32>
    %cst_6 = arith.constant 5.000000e-01 : f32
    %8 = vector.broadcast %cst_6 : f32 to vector<16x128xf32>
    %9 = arith.mulf %8, %7 : vector<16x128xf32>
    %cst_7 = arith.constant 4.471500e-02 : f32
    %10 = vector.broadcast %cst_7 : f32 to vector<16x128xf32>
    %11 = arith.mulf %10, %7 : vector<16x128xf32>
    %12 = arith.mulf %11, %7 : vector<16x128xf32>
    %13 = arith.mulf %12, %7 : vector<16x128xf32>
    %14 = arith.addf %7, %13 : vector<16x128xf32>
    %cst_8 = arith.constant 0.797884583 : f32
    %15 = vector.broadcast %cst_8 : f32 to vector<16x128xf32>
    %16 = arith.mulf %15, %14 : vector<16x128xf32>
    %17 = math.tanh %16 : vector<16x128xf32>
    %cst_9 = arith.constant 1.000000e+00 : f32
    %18 = vector.broadcast %cst_9 : f32 to vector<16x128xf32>
    %19 = arith.addf %18, %17 : vector<16x128xf32>
    %20 = arith.mulf %9, %19 : vector<16x128xf32>
    %21 = arith.truncf %20 : vector<16x128xf32> to vector<16x128xbf16>
    %c0_10 = arith.constant 0 : index
    %c0_11 = arith.constant 0 : index
    %22 = vector.load %arg4[%c0_10, %c0_11] : memref<128x128xbf16, #tpu.memory_space<vmem>>, vector<128x128xbf16>
    %cst_12 = arith.constant dense<0.000000e+00> : vector<16x128xf32>
    %23 = tpu.matmul %21, %22, %cst_12 {dimension_numbers = #tpu.dot_dimension_numbers<[1], [0], [0], [1], [0, 0, 1, 1], [], []>} : vector<16x128xbf16>, vector<128x128xbf16>, vector<16x128xf32> -> vector<16x128xf32>
    %24 = arith.addf %2, %23 : vector<16x128xf32>
    %25 = arith.addf %0, %24 : vector<16x128xf32>
    %c0_13 = arith.constant 0 : index
    %c0_14 = arith.constant 0 : index
    %26 = vector.load %arg5[%c0_13, %c0_14] : memref<1x128xf32, #tpu.memory_space<vmem>>, vector<1x128xf32>
    %27 = vector.broadcast %26 : vector<1x128xf32> to vector<16x128xf32>
    %28 = arith.addf %25, %27 : vector<16x128xf32>
    %cst_15 = arith.constant dense<0.000000e+00> : vector<16xf32>
    %29 = vector.multi_reduction <add>, %28, %cst_15 [1] : vector<16x128xf32> to vector<16xf32>
    %30 = vector.shape_cast %29 : vector<16xf32> to vector<16x1xf32>
    %cst_16 = arith.constant 3.125000e-02 : f32
    %31 = vector.broadcast %cst_16 : f32 to vector<16x1xf32>
    %32 = arith.mulf %30, %31 : vector<16x1xf32>
    %33 = vector.broadcast %32 : vector<16x1xf32> to vector<16x128xf32>
    %34 = arith.subf %28, %33 : vector<16x128xf32>
    %35 = tpu.iota {dimensions = array<i32: 1>} : vector<16x128xi32>
    %c32_i32 = arith.constant 32 : i32
    %36 = vector.broadcast %c32_i32 : i32 to vector<16x128xi32>
    %37 = arith.cmpi slt, %35, %36 : vector<16x128xi32>
    %cst_17 = arith.constant 0.000000e+00 : f32
    %38 = vector.broadcast %cst_17 : f32 to vector<16x128xf32>
    %39 = arith.select %37, %34, %38 : vector<16x128xi1>, vector<16x128xf32>
    %40 = arith.mulf %39, %39 : vector<16x128xf32>
    %cst_18 = arith.constant dense<0.000000e+00> : vector<16xf32>
    %41 = vector.multi_reduction <add>, %40, %cst_18 [1] : vector<16x128xf32> to vector<16xf32>
    %42 = vector.shape_cast %41 : vector<16xf32> to vector<16x1xf32>
    %cst_19 = arith.constant 3.125000e-02 : f32
    %43 = vector.broadcast %cst_19 : f32 to vector<16x1xf32>
    %44 = arith.mulf %42, %43 : vector<16x1xf32>
    %cst_20 = arith.constant 9.99999974E-6 : f32
    %45 = vector.broadcast %cst_20 : f32 to vector<16x1xf32>
    %46 = arith.addf %44, %45 : vector<16x1xf32>
    %47 = math.rsqrt %46 : vector<16x1xf32>
    %48 = vector.broadcast %47 : vector<16x1xf32> to vector<16x128xf32>
    %49 = arith.mulf %39, %48 : vector<16x128xf32>
    %c0_21 = arith.constant 0 : index
    %c0_22 = arith.constant 0 : index
    %50 = vector.load %arg6[%c0_21, %c0_22] : memref<1x128xf32, #tpu.memory_space<vmem>>, vector<1x128xf32>
    %51 = vector.broadcast %50 : vector<1x128xf32> to vector<16x128xf32>
    %52 = arith.mulf %49, %51 : vector<16x128xf32>
    %c0_23 = arith.constant 0 : index
    %c0_24 = arith.constant 0 : index
    %53 = vector.load %arg7[%c0_23, %c0_24] : memref<1x128xf32, #tpu.memory_space<vmem>>, vector<1x128xf32>
    %54 = vector.broadcast %53 : vector<1x128xf32> to vector<16x128xf32>
    %55 = arith.addf %52, %54 : vector<16x128xf32>
    %c0_25 = arith.constant 0 : index
    %c0_26 = arith.constant 0 : index
    %56 = vector.load %arg8[%c0_25, %c0_26] : memref<16x128xf32, #tpu.memory_space<vmem>>, vector<16x128xf32>
    tpu.vector_store %arg8[%c0_25, %c0_26], %55 {strides = array<i32>} : memref<16x128xf32, #tpu.memory_space<vmem>>, vector<16x128xf32>,
    return
  }
  func.func @transform_0(%arg0: i32) -> (i32, i32) {
    %c0_i32 = arith.constant 0 : i32
    %c0_i32_0 = arith.constant 0 : i32
    return %arg0, %c0_i32 : i32, i32
  }
  func.func @transform_1(%arg0: i32) -> (i32, i32) {
    %c0_i32 = arith.constant 0 : i32
    %c0_i32_0 = arith.constant 0 : i32
    %c0_i32_1 = arith.constant 0 : i32
    return %c0_i32, %c0_i32_0 : i32, i32
  }
  func.func @transform_2(%arg0: i32) -> (i32, i32) {
    %c0_i32 = arith.constant 0 : i32
    %c0_i32_0 = arith.constant 0 : i32
    %c0_i32_1 = arith.constant 0 : i32
    return %c0_i32, %c0_i32_0 : i32, i32
  }
  func.func @transform_3(%arg0: i32) -> (i32, i32) {
    %c0_i32 = arith.constant 0 : i32
    %c0_i32_0 = arith.constant 0 : i32
    %c0_i32_1 = arith.constant 0 : i32
    return %c0_i32, %c0_i32_0 : i32, i32
  }
  func.func @transform_4(%arg0: i32) -> (i32, i32) {
    %c0_i32 = arith.constant 0 : i32
    %c0_i32_0 = arith.constant 0 : i32
    %c0_i32_1 = arith.constant 0 : i32
    return %c0_i32, %c0_i32_0 : i32, i32
  }
  func.func @transform_5(%arg0: i32) -> (i32, i32) {
    %c0_i32 = arith.constant 0 : i32
    %c0_i32_0 = arith.constant 0 : i32
    %c0_i32_1 = arith.constant 0 : i32
    return %c0_i32, %c0_i32_0 : i32, i32
  }
  func.func @transform_6(%arg0: i32) -> (i32, i32) {
    %c0_i32 = arith.constant 0 : i32
    %c0_i32_0 = arith.constant 0 : i32
    %c0_i32_1 = arith.constant 0 : i32
    return %c0_i32, %c0_i32_0 : i32, i32
  }
  func.func @transform_7(%arg0: i32) -> (i32, i32) {
    %c0_i32 = arith.constant 0 : i32
    %c0_i32_0 = arith.constant 0 : i32
    return %arg0, %c0_i32 : i32, i32
  }
}

</mosaic_0001>

<bundles_post_ra>
// kernel: tpu_custom_call.1
= control target key start
LH: loop header
LB: loop body
LE: loop exit
PB: predicated region body
PF: predicated region fallthrough
CT: control target
= control target key end

     0   :  { %12 = vsyncpa [#allocation3], 0  ;;  %s623_s0 = inlined_call_operand.hbm [shape: f32[16,128], index: 0, kind: input, shape index: {}]   ;;  %s624_s1 = inlined_call_operand.hbm [shape: bf16[128,128], index: 1, kind: input, shape index: {}]   ;;  %s625_s2 = inlined_call_operand.vmem [shape: f32[1,128], index: 2, kind: input, shape index: {}]   ;;  %s626_s3 = inlined_call_operand.hbm [shape: bf16[128,128], index: 3, kind: input, shape index: {}]   ;;  %s627_s4 = inlined_call_operand.vmem [shape: f32[1,128], index: 4, kind: input, shape index: {}]   ;;  %s628_s5 = inlined_call_operand.vmem [shape: f32[1,128], index: 5, kind: input, shape index: {}]   ;;  %s629_s6 = inlined_call_operand.vmem [shape: f32[1,128], index: 6, kind: input, shape index: {}]   ;;  %s630_s7 = inlined_call_operand.hbm [shape: f32[16,128], index: 7, kind: output, shape index: {}]  }
   0x1   :  { %13 = vsyncpa [#allocation6], 0  ;;  %s32_s26 = sshll.u32 %s624_s1, 4  ;;  %s33_s26 = int_to_ptr.hbm [resolvable:$true] %s32_s26 }
   0x2   :  { %14 = vsyncpa [#allocation4], 0  ;;  %s545_s27 = smov [#allocation5]   ;;  %s19_s8 = sshll.u32 %s623_s0, 4  ;;  %s20_s8 = int_to_ptr.hbm [resolvable:$true] %s19_s8 }
   0x3   :  { %s34_s28 = sshll.u32 %s545_s27, 4  ;;  %s546_s9 = smov 64   ;;  %s35_s28 = int_to_ptr.vmem [resolvable:$true] %s34_s28 }
   0x4   :  { %s547_s10 = smov 4   ;;  %s548_s11 = smov [#allocation2]  }
   0x5   :  { %40 = dma.hbm_to_vmem [thread:$0]  %s33_s26, 1024, %s35_s28, [#allocation6], %s546_s9, %s546_s9, %s547_s10  }
   0x6   :  { %s21_s12 = sshll.u32 %s548_s11, 4  ;;  %s549_s13 = smov 128   ;;  %s22_s12 = int_to_ptr.vmem [resolvable:$true] %s21_s12 }
   0x7   :  { %s550_s14 = smov 8   ;;  %s47_s16 = sshll.u32 %s626_s3, 4  ;;  %s48_s16 = int_to_ptr.hbm [resolvable:$true] %s47_s16 }
   0x8   :  { %27 = dma.hbm_to_vmem [thread:$0]  %s20_s8, 256, %s22_s12, [#allocation3], %s549_s13, %s549_s13, %s550_s14  }
   0x9   :  { %s551_s17 = smov [#allocation7]  }
   0xa   :  { %s49_s0 = sshll.u32 %s551_s17, 4  ;;  %s50_s0 = int_to_ptr.vmem [resolvable:$true] %s49_s0 }
   0xb   :  { %55 = dma.hbm_to_vmem [thread:$0]  %s48_s16, 1024, %s50_s0, [#allocation6], %s546_s9, %s546_s9, %s547_s10  }
   0xc   :  { %539 = dma.done.wait [#allocation3], 256  }
   0xd   :  { %540 = vsyncadd [#allocation3], 4294967040 }
   0xe   :  { %541 = dma.done.wait [#allocation6], 2048  }
   0xf   :  { %542 = vsyncadd [#allocation6], 4294965248  ;;  %v414_v0 = vld [vmem:[#allocation5 + $0x38] sm:$0xff]  ;;  %v413_v1 = vld [vmem:[#allocation5 + $0x30] sm:$0xff]  ;;  %v272_v50 = vlaneseq  ;;  %s552_s23 = smov [#allocation8]   ;;  %s329_s26 = sshll.u32 %s630_s7, 4  ;;  %s330_s26 = int_to_ptr.hbm [resolvable:$true] %s329_s26 }
  0x10   :  { %145 = vmatpush.bf16.msra.mxu0 %v414_v0  ;;  %v412_v2 = vld [vmem:[#allocation5 + $0x28] sm:$0xff]  ;;  %v411_v3 = vld [vmem:[#allocation5 + $0x20] sm:$0xff]  ;;  %v410_v4 = vld [vmem:[#allocation5 + $0x18] sm:$0xff] }
  0x11   :  { %v409_v5 = vld [vmem:[#allocation5 + $0x10] sm:$0xff]  ;;  %v408_v6 = vld [vmem:[#allocation5 + $0x8] sm:$0xff]  ;;  %v407_v7 = vld [vmem:[#allocation5] sm:$0xff]  ;;  %v273_v51 = vand.u32 127, %v272_v50 }
  0x12   :  { %v74_v8 = vld [vmem:[#allocation2] sm:$0xff]  ;;  %v75_v9 = vld [vmem:[#allocation2 + $0x8] sm:$0xff]  ;;  %v420_v13 = vld [vmem:[#allocation7 + $0x28] sm:$0xff] }
  0x13   :  { %v76_v10 = vpack.c.bf16 %v75_v9, %v74_v8  ;;  %v422_v11 = vld [vmem:[#allocation7 + $0x38] sm:$0xff]  ;;  %v421_v12 = vld [vmem:[#allocation7 + $0x30] sm:$0xff]  ;;  %v419_v14 = vld [vmem:[#allocation7 + $0x20] sm:$0xff]  ;;  %vm274_vm0 = vcmp.lt.s32.totalorder %v273_v51, 32 }
  0x14   :  { %146 = vmatpush.bf16.msra.mxu0 %v413_v1  ;;  %242 = vmatpush.bf16.msra.mxu1 %v422_v11  ;;  %v418_v15 = vld [vmem:[#allocation7 + $0x18] sm:$0xff]  ;;  %v417_v16 = vld [vmem:[#allocation7 + $0x10] sm:$0xff]  ;;  %v416_v17 = vld [vmem:[#allocation7 + $0x8] sm:$0xff] }
  0x15   :  { %v415_v18 = vld [vmem:[#allocation7] sm:$0xff]  ;;  %v431_v19 = vld [vmem:[%s625_s2] ss:$0 sm:$0xff] }
  0x16   :  { %v432_v43 = vld [vmem:[%s627_s4] ss:$0 sm:$0xff] }
  0x18   :  { %147 = vmatpush.bf16.msra.mxu0 %v412_v2  ;;  %243 = vmatpush.bf16.msra.mxu1 %v421_v12  ;;  %v433_v12 = vld [vmem:[%s628_s5] ss:$0 sm:$0xff]  ;;  %s327_s5 = sshll.u32 %s552_s23, 4  ;;  %s328_s5 = int_to_ptr.vmem [resolvable:$true] %s327_s5 }
  0x1c   :  { %148 = vmatpush.bf16.msra.mxu0 %v411_v3  ;;  %244 = vmatpush.bf16.msra.mxu1 %v420_v13 }
  0x20   :  { %149 = vmatpush.bf16.msra.mxu0 %v410_v4  ;;  %245 = vmatpush.bf16.msra.mxu1 %v419_v14 }
  0x24   :  { %150 = vmatpush.bf16.msra.mxu0 %v409_v5  ;;  %246 = vmatpush.bf16.msra.mxu1 %v418_v15 }
  0x28   :  { %151 = vmatpush.bf16.msra.mxu0 %v408_v6  ;;  %247 = vmatpush.bf16.msra.mxu1 %v417_v16  ;;  %v434_v16 = vld [vmem:[%s629_s6] ss:$0 sm:$0xff] }
  0x2c   :  { %152 = vmatpush.bf16.msra.mxu0 %v407_v7  ;;  %248 = vmatpush.bf16.msra.mxu1 %v416_v17 }
  0x2f   :  { %153 = vmatmul.bf16.vlgmr.msra.gmra.mxu0 %v76_v10 }
  0x30   :  { %249 = vmatpush.bf16.msra.mxu1 %v415_v18 }
  0xac   :  { %v154_v20 = vpop.f32.mrf.mxu0 }
  0xad   :  { %v155_v21 = vadd.f32 %v431_v19, %v154_v20 }
  0xaf   :  { %v161_v22 = vmul.f32 0.044715, %v155_v21  ;;  %v159_v37 = vmul.f32 0.5, %v155_v21 }
  0xb1   :  { %v163_v23 = vmul.f32 %v161_v22, %v155_v21 }
  0xb3   :  { %v165_v24 = vmul.f32 %v163_v23, %v155_v21 }
  0xb4   :  { %v156_v25 = vpop.f32.mrf.mxu0 }
  0xb5   :  { %v157_v26 = vadd.f32 %v431_v19, %v156_v25  ;;  %v167_v27 = vadd.f32 %v165_v24, %v155_v21 }
  0xb7   :  { %v162_v28 = vmul.f32 0.044715, %v157_v26  ;;  %v169_v30 = vmul.f32 0.7978846, %v167_v27  ;;  %v160_v38 = vmul.f32 0.5, %v157_v26 }
  0xb9   :  { %v164_v29 = vmul.f32 %v162_v28, %v157_v26  ;;  %435 = vtanh.f32 %v169_v30 }
  0xbb   :  { %v166_v31 = vmul.f32 %v164_v29, %v157_v26 }
  0xbd   :  { %v168_v32 = vadd.f32 %v166_v31, %v157_v26 }
  0xbf   :  { %v170_v33 = vmul.f32 0.7978846, %v168_v32  ;;  %v436_v34 = vpop.eup %435 }
  0xc0   :  { %v173_v35 = vadd.f32 1.0, %v436_v34 }
  0xc1   :  { %437 = vtanh.f32 %v170_v33 }
  0xc2   :  { %v175_v40 = vmul.f32 %v173_v35, %v159_v37 }
  0xc7   :  { %v438_v36 = vpop.eup %437 }
  0xc8   :  { %v174_v39 = vadd.f32 1.0, %v438_v36 }
  0xca   :  { %v176_v41 = vmul.f32 %v174_v39, %v160_v38 }
  0xcc   :  { %v177_v42 = vpack.c.bf16 %v176_v41, %v175_v40 }
  0xce   :  { %250 = vmatmul.bf16.vlgmr.msra.gmra.mxu1 %v177_v42 }
 0x14b   :  { %v251_v44 = vpop.f32.mrf.mxu1 }
 0x14c   :  { %v256_v45 = vadd.f32 %v251_v44, %v74_v8 }
 0x14e   :  { %v262_v46 = vadd.f32 %v432_v43, %v256_v45 }
 0x150   :  { %264 = vadd.xlane.f32.xlu0 %v262_v46 }
 0x153   :  { %v253_v47 = vpop.f32.mrf.mxu1 }
 0x154   :  { %v257_v48 = vadd.f32 %v253_v47, %v75_v9 }
 0x156   :  { %v263_v49 = vadd.f32 %v432_v43, %v257_v48 }
 0x158   :  { %266 = vadd.xlane.f32.xlu0 %v263_v49 }
 0x1c3   :  { %v265_v52 = vpop.xlane.xlu0 %264 }
 0x1c4   :  { %v268_v53 = vmul.f32 0.03125, %v265_v52 }
 0x1c6   :  { %v270_v54 = vsub.f32 %v262_v46, %v268_v53 }
 0x1c8   :  { %v275_v55 = vsel %vm274_vm0, %v270_v54, 0.0 }
 0x1c9   :  { %v277_v56 = vmul.f32 %v275_v55, %v275_v55 }
 0x1cb   :  { %279 = vadd.xlane.f32.xlu1 %v277_v56  ;;  %v267_v57 = vpop.xlane.xlu0 %266 }
 0x1cc   :  { %v269_v58 = vmul.f32 0.03125, %v267_v57 }
 0x1ce   :  { %v271_v59 = vsub.f32 %v263_v49, %v269_v58 }
 0x1d0   :  { %v276_v60 = vsel %vm274_vm0, %v271_v59, 0.0 }
 0x1d1   :  { %v278_v61 = vmul.f32 %v276_v60, %v276_v60 }
 0x1d3   :  { %281 = vadd.xlane.f32.xlu1 %v278_v61 }
 0x23e   :  { %v280_v62 = vpop.xlane.xlu1 %279 }
 0x23f   :  { %v283_v63 = vmul.f32 0.03125, %v280_v62 }
 0x241   :  { %v285_v0 = vadd.f32 1e-05, %v283_v63 }
 0x243   :  { %439 = vrsqrt.f32 %v285_v0  ;;  %vm293_vm2 = vweird.f32 %v285_v0 }
 0x246   :  { %v282_v1 = vpop.xlane.xlu1 %281 }
 0x247   :  { %v284_v2 = vmul.f32 0.03125, %v282_v1 }
 0x249   :  { %v440_v3 = vpop.eup %439  ;;  %v286_v4 = vadd.f32 1e-05, %v284_v2 }
 0x24a   :  { %v288_v5 = vmul.f32 %v440_v3, %v285_v0  ;;  %vm294_vm1 = vweird.f32 %v440_v3 }
 0x24b   :  { %441 = vrsqrt.f32 %v286_v4  ;;  %vm295_vm3 = vmor %vm293_vm2, %vm294_vm1  ;;  %vm303_vm5 = vweird.f32 %v286_v4 }
 0x24c   :  { %v289_v6 = vmul.f32 %v440_v3, %v288_v5 }
 0x24e   :  { %v290_v7 = vmul.f32 0.5, %v289_v6 }
 0x250   :  { %v291_v8 = vsub.f32 1.5, %v290_v7 }
 0x251   :  { %v442_v9 = vpop.eup %441 }
 0x252   :  { %v292_v10 = vmul.f32 %v440_v3, %v291_v8  ;;  %v298_v11 = vmul.f32 %v442_v9, %v286_v4  ;;  %vm304_vm4 = vweird.f32 %v442_v9 }
 0x253   :  { %vm305_vm6 = vmor %vm303_vm5, %vm304_vm4 }
 0x254   :  { %v296_v13 = vsel %vm295_vm3, %v440_v3, %v292_v10  ;;  %v299_v14 = vmul.f32 %v442_v9, %v298_v11 }
 0x255   :  { %v307_v15 = vmul.f32 %v296_v13, %v275_v55 }
 0x256   :  { %v300_v17 = vmul.f32 0.5, %v299_v14 }
 0x257   :  { %v313_v18 = vmul.f32 %v433_v12, %v307_v15 }
 0x258   :  { %v301_v19 = vsub.f32 1.5, %v300_v17 }
 0x259   :  { %v319_v20 = vadd.f32 %v434_v16, %v313_v18 }
 0x25a   :  { %v302_v21 = vmul.f32 %v442_v9, %v301_v19 }
 0x25b   :  { %321 = vst [vmem:[#allocation8] sm:$0xff] %v319_v20 }
 0x25c   :  { %v306_v22 = vsel %vm305_vm6, %v442_v9, %v302_v21 }
 0x25d   :  { %v308_v23 = vmul.f32 %v306_v22, %v276_v60 }
 0x25f   :  { %v314_v24 = vmul.f32 %v433_v12, %v308_v23 }
 0x261   :  { %v320_v25 = vadd.f32 %v434_v16, %v314_v24 }
 0x263   :  { %322 = vst [vmem:[#allocation8 + $0x8] sm:$0xff] %v320_v25 }
 0x264   :  { %335 = dma.vmem_to_hbm [thread:$0]  %s328_s5, 256, %s330_s26, [#allocation4], %s549_s13, %s549_s13, %s550_s14  }
 0x265   :  { %543 = dma.done.wait [#allocation4], 256  }
 0x266   :  { %544 = vsyncadd [#allocation4], 4294967040 }
 0x267   :  { %340 = vsyncpa [#allocation3], 1 }
 0x268   :  { %341 = vsyncpa [#allocation6], 1 }
 0x269   :  { %342 = vsyncpa [#allocation4], 1 }

</bundles_post_ra>
